<compile_context>
chip_gen: v5e
topology: v5e:2x2
jax: 0.10.0
libtpu: 0.0.40
codegen_flags: <defaults>
</compile_context>

<pallas_src>
import math

import jax
import jax.numpy as jnp
from jax.experimental import pallas as pl
from jax.experimental.pallas import tpu as pltpu


def _hbm_copy_kernel(x_hbm, o_hbm, sem):
    # Single whole-array HBM->HBM DMA copy.
    cp = pltpu.make_async_copy(x_hbm, o_hbm, sem)
    cp.start()
    cp.wait()


def _flatten_out_shape(shape, size, n_dims):
    """torch Flatten(n_dims) output shape (matches x.reshape semantics)."""
    if n_dims < 0:
        # x.reshape(*x.shape[:n_dims], -1): flatten the last |n_dims| dims.
        tail_dims = shape[n_dims:]
        tail = math.prod(tail_dims) if tail_dims else 1
        return tuple(shape[:n_dims]) + (tail,)
    # x.reshape(-1, *x.shape[n_dims:]): flatten the first n_dims dims.
    kept = tuple(shape[n_dims:])
    kept_sz = math.prod(kept) if kept else 1
    lead = size // max(kept_sz, 1)
    return (lead,) + kept


def flatten_pallas(x, n_dims: int, force_copy: bool = False):
    """Reproduces torch Flatten(n_dims).forward(x) semantics on TPU.

    Default path is a metadata-only reshape (the optimal implementation).
    force_copy=True materializes a fresh buffer via a single HBM->HBM DMA.
    """
    shape = tuple(x.shape)
    n = x.size
    out_shape = _flatten_out_shape(shape, n, n_dims)

    if not force_copy or n == 0:
        # Pure metadata: no data movement required for a contiguous flatten.
        return jnp.reshape(x, out_shape)

    # Physical copy requested: HBM->HBM DMA of the (metadata-)flattened view.
    x_view = jnp.reshape(x, out_shape)  # metadata-only
    itemsize = jnp.dtype(x.dtype).itemsize
    return pl.pallas_call(
        _hbm_copy_kernel,
        out_shape=jax.ShapeDtypeStruct(out_shape, x.dtype),
        in_specs=[pl.BlockSpec(memory_space=pl.ANY)],
        out_specs=pl.BlockSpec(memory_space=pl.ANY),
        scratch_shapes=[pltpu.SemaphoreType.DMA],
        cost_estimate=pl.CostEstimate(
            flops=0, transcendentals=0, bytes_accessed=2 * n * itemsize),
    )(x_view)


if __name__ == "__main__":
    key = jax.random.PRNGKey(0)

    # NCHW-style input: batch=2, channels=4, spatial=16x16.
    x = jax.random.normal(key, (2, 4, 16, 16), dtype=jnp.float32)

    # Flatten first 2 dims: (2,4,16,16) -> (8,16,16)   [default metadata path]
    y_pos = flatten_pallas(x, 2)
    jax.block_until_ready(y_pos)
    ref_pos = jnp.reshape(x, (-1,) + x.shape[2:])
    assert y_pos.shape == (8, 16, 16), y_pos.shape
    assert jnp.array_equal(y_pos, ref_pos)

    # Flatten last 2 dims: (2,4,16,16) -> (2,4,256)    [default metadata path]
    y_neg = flatten_pallas(x, -2)
    jax.block_until_ready(y_neg)
    ref_neg = jnp.reshape(x, x.shape[:-2] + (-1,))
    assert y_neg.shape == (2, 4, 256), y_neg.shape
    assert jnp.array_equal(y_neg, ref_neg)

    # Exercise the Pallas HBM->HBM DMA copy path explicitly.
    y_copy = flatten_pallas(x, -2, force_copy=True)
    jax.block_until_ready(y_copy)
    assert y_copy.shape == (2, 4, 256), y_copy.shape
    assert jnp.array_equal(y_copy, ref_neg)

    # Awkward element count (no multiple-of-128 factor): DMA does not care
    # about (8,128) tiling, so the copy path still works and stays exact.
    xf = jax.random.normal(key, (3, 5, 7), dtype=jnp.float32)
    yf = flatten_pallas(xf, -2, force_copy=True)
    jax.block_until_ready(yf)
    assert yf.shape == (3, 35), yf.shape
    assert jnp.array_equal(yf, jnp.reshape(xf, (3, -1)))

    # Edge case: n_dims == -len(shape) flattens everything -> 1-D.
    y_all = flatten_pallas(x, -4)
    jax.block_until_ready(y_all)
    assert y_all.shape == (2 * 4 * 16 * 16,), y_all.shape
    assert jnp.array_equal(y_all, jnp.reshape(x, (-1,)))

    print("KERNEL_OK")
</pallas_src>

<mosaic_0001>
module attributes {stable_mosaic.version = 11 : i64} {
  func.func @_hbm_copy_kernel(%arg0: memref<2x4x256xf32, #tpu.memory_space<any>>, %arg1: memref<2x4x256xf32, #tpu.memory_space<any>>, %arg2: memref<!tpu.dma_semaphore, #tpu.memory_space<semaphore_mem>>) attributes {dimension_semantics = [], scalar_prefetch = 0 : i64, scratch_operands = 1 : i64, tpu.core_type = #tpu.core_type<tc>} {
    tpu.enqueue_dma source(%arg0 : memref<2x4x256xf32, #tpu.memory_space<any>>) target(%arg1 : memref<2x4x256xf32, #tpu.memory_space<any>>) target_semaphore(%arg2 : memref<!tpu.dma_semaphore, #tpu.memory_space<semaphore_mem>>)
    tpu.wait_dma2 semaphore(%arg2 : memref<!tpu.dma_semaphore, #tpu.memory_space<semaphore_mem>>) src(%arg0 : memref<2x4x256xf32, #tpu.memory_space<any>>) dst(%arg1 : memref<2x4x256xf32, #tpu.memory_space<any>>)
    return
  }
}

</mosaic_0001>

<bundles_post_ra>
// kernel: tpu_custom_call.1
= control target key start
LH: loop header
LB: loop body
LE: loop exit
PB: predicated region body
PF: predicated region fallthrough
CT: control target
= control target key end

     0   :  { %s34_s12 = smov [#allocation2]   ;;  %s35_s13 = smov [#allocation3]   ;;  %s53_s0 = inlined_call_operand.hbm [shape: f32[2,4,256], index: 0, kind: input, shape index: {}]   ;;  %s54_s1 = inlined_call_operand.hbm [shape: f32[2,4,256], index: 1, kind: output, shape index: {}]  }
   0x1   :  { %s10_s8 = sshll.u32 %s53_s0, 4  ;;  %s12_s11 = sshll.u32 %s54_s1, 4  ;;  %s11_s8 = int_to_ptr.hbm [resolvable:$true] %s10_s8  ;;  %s13_s11 = int_to_ptr.hbm [resolvable:$true] %s12_s11 }
   0x2   :  { %s36_s14 = smov 0  }
   0x3   :  { %16 = dma.general %s11_s8, 256, %s13_s11, %s34_s12, %s35_s13, [#allocation4], %s36_s14, 0  }
   0x4   :  { %32 = dma.done.wait [#allocation2], 256 }
   0x5   :  { %33 = vsyncadd [#allocation2], 4294967040 }
   0x6   :  { %22 = vsyncmov [#allocation2] }
   0x9   :  { %s23_s15 = vpop.sfrf %22 }
   0xa   :  { %p28_p0 = scmp.ne.s32.totalorder %s23_s15, 0 }
   0xc   :  { %27 = shalt.err (%p28_p0)  }

</bundles_post_ra>
